<compile_context>
chip_gen: v7x
topology: tpu7x:2x2x1
jax: 0.10.0
libtpu: 0.0.40
codegen_flags: <defaults>
</compile_context>

<pallas_src>
import jax
import jax.numpy as jnp
from jax.experimental import pallas as pl
from jax.experimental.pallas import tpu as pltpu

HIDDEN = 4                 # tau_Net default hidden=4
D_IN = 2
D_MID = 32
N_OUT = 3 * HIDDEN         # fused rates | concs | weight-logits = 12 rows


def _tau_net_kernel(x_ref, pa_ref, wh_ref, bh_ref, out_ref):
    # x_ref:  (2, TB)      batch on lanes
    # pa_ref: (32, 3)      columns: [W1[:,feat0], W1[:,feat1], b1]
    # wh_ref: (12, 32)     fused head weights (rates | concs | weight-logits)
    # bh_ref: (12, 1)      fused head biases
    # out_ref: (12, TB)    fused lane-dense output
    x = x_ref[...]
    pa = pa_ref[...]

    # First layer on the VPU: h = tanh(W1^T x + b1), shape (32, TB).
    h = jnp.tanh(pa[:, 0:1] * x[0:1, :]
                 + pa[:, 1:2] * x[1:2, :]
                 + pa[:, 2:3])                                   # (32, TB)

    # All three heads in a single MXU matmul, f32 accumulation.
    out = jnp.dot(wh_ref[...], h,
                  preferred_element_type=jnp.float32) + bh_ref[...]  # (12, TB)

    # Softmax over the head axis for action_head3 (rows 8:12).  This is the
    # original dim=1 of the (B, hidden) layout, now the sublane axis.
    logits = out[8:12, :]
    logits = logits - jnp.max(logits, axis=0, keepdims=True)
    e = jnp.exp(logits)
    w = e * pl.reciprocal(jnp.sum(e, axis=0, keepdims=True), approx=False)

    out_ref[0:8, :] = out[0:8, :]      # rates (rows 0:4), concs (rows 4:8)
    out_ref[8:12, :] = w               # softmaxed weights


def pack_params(params):
    """Pack the 8 PyTorch-style tensors into 3 kernel-layout arrays."""
    w1, b1 = params["w1"], params["b1"]          # (2,32), (32,)
    w2, b2 = params["w2"], params["b2"]          # (32,4), (4,)
    w3, b3 = params["w3"], params["b3"]
    w4, b4 = params["w4"], params["b4"]
    p_aff = jnp.stack([w1[0, :], w1[1, :], b1], axis=1)          # (32, 3)
    w_heads = jnp.concatenate([w2.T, w3.T, w4.T], axis=0)        # (12, 32)
    b_heads = jnp.concatenate([b2, b3, b4]).reshape(N_OUT, 1)    # (12, 1)
    return p_aff, w_heads, b_heads


def tau_net_forward(x, params, *, block_b=4096):
    """x: (B, 2) float32 -> (rates (B,4), concs (B,4), softmax weights (B,4))."""
    B = x.shape[0]
    p_aff, w_heads, b_heads = pack_params(params)

    # Transpose so batch is lane-dense inside the kernel.
    x_t = x.astype(jnp.float32).T                                # (2, B)

    if B <= block_b:
        tb, b_pad = B, B                 # single full block (last dim == full)
    else:
        tb = block_b                     # multiple of 128
        b_pad = -(-B // tb) * tb
        if b_pad != B:
            x_t = jnp.pad(x_t, ((0, 0), (0, b_pad - B)))

    grid = (b_pad // tb,)
    const = lambda i: (0, 0)             # params stay resident across the grid

    out_t = pl.pallas_call(
        _tau_net_kernel,
        out_shape=jax.ShapeDtypeStruct((N_OUT, b_pad), jnp.float32),
        grid=grid,
        in_specs=[
            pl.BlockSpec((D_IN, tb), lambda i: (0, i)),   # streamed batch tiles
            pl.BlockSpec((D_MID, 3), const),
            pl.BlockSpec((N_OUT, D_MID), const),
            pl.BlockSpec((N_OUT, 1), const),
        ],
        out_specs=pl.BlockSpec((N_OUT, tb), lambda i: (0, i)),
        compiler_params=pltpu.CompilerParams(
            dimension_semantics=("parallel",)),
    )(x_t, p_aff, w_heads, b_heads)

    out_t = out_t[:, :B]
    rates = out_t[0:HIDDEN, :].T
    concs = out_t[HIDDEN:2 * HIDDEN, :].T
    weights = out_t[2 * HIDDEN:, :].T
    return rates, concs, weights


def init_params(key):
    """Deterministic init mimicking nn.Linear default U[-1/sqrt(fan_in), +...].
    Weights stored as (in, out); reference computes x @ W + b."""
    ks = jax.random.split(key, 8)

    def lin(kw, kb, fan_in, fan_out):
        bound = 1.0 / jnp.sqrt(float(fan_in))
        w = jax.random.uniform(kw, (fan_in, fan_out), jnp.float32, -bound, bound)
        b = jax.random.uniform(kb, (fan_out,), jnp.float32, -bound, bound)
        return w, b

    w1, b1 = lin(ks[0], ks[1], D_IN, D_MID)       # affine1
    w2, b2 = lin(ks[2], ks[3], D_MID, HIDDEN)     # action_head1 -> rates
    w3, b3 = lin(ks[4], ks[5], D_MID, HIDDEN)     # action_head2 -> concs
    w4, b4 = lin(ks[6], ks[7], D_MID, HIDDEN)     # action_head3 -> weights
    return dict(w1=w1, b1=b1, w2=w2, b2=b2, w3=w3, b3=b3, w4=w4, b4=b4)


def tau_net_ref(x, p):
    h = jnp.tanh(x @ p["w1"] + p["b1"])
    rates = h @ p["w2"] + p["b2"]
    concs = h @ p["w3"] + p["b3"]
    weights = jax.nn.softmax(h @ p["w4"] + p["b4"], axis=1)
    return rates, concs, weights


# TODO(synk): tau_Net.log_probs is training-time bookkeeping (a Python list),
# not part of the forward pass, so it is not represented in the kernel.

if __name__ == "__main__":
    key = jax.random.PRNGKey(0)
    k_x, k_p = jax.random.split(key)
    params = init_params(k_p)

    # small shape consistent with the module (batch=8, features=2)
    B = 8
    x = jax.random.normal(k_x, (B, D_IN), jnp.float32)

    rates, concs, weights = jax.block_until_ready(tau_net_forward(x, params))

    # sanity-check against pure-JAX reference
    r_ref, c_ref, w_ref = tau_net_ref(x, params)
    assert jnp.allclose(rates, r_ref, atol=1e-5, rtol=1e-5)
    assert jnp.allclose(concs, c_ref, atol=1e-5, rtol=1e-5)
    assert jnp.allclose(weights, w_ref, atol=1e-5, rtol=1e-5)
    assert jnp.allclose(jnp.sum(weights, axis=1), 1.0, atol=1e-5)

    # also exercise the tiled (multi-block, padded) path once
    B2 = 5000
    x2 = jax.random.normal(k_x, (B2, D_IN), jnp.float32)
    r2, c2, w2 = jax.block_until_ready(tau_net_forward(x2, params))
    r2_ref, c2_ref, w2_ref = tau_net_ref(x2, params)
    assert jnp.allclose(r2, r2_ref, atol=1e-5, rtol=1e-5)
    assert jnp.allclose(c2, c2_ref, atol=1e-5, rtol=1e-5)
    assert jnp.allclose(w2, w2_ref, atol=1e-5, rtol=1e-5)

    print("KERNEL_OK")
</pallas_src>

<mosaic_0001>
module attributes {stable_mosaic.version = 11 : i64} {
  func.func @_tau_net_kernel(%arg0: i32, %arg1: memref<2x8xf32, #tpu.memory_space<vmem>>, %arg2: memref<32x3xf32, #tpu.memory_space<vmem>>, %arg3: memref<12x32xf32, #tpu.memory_space<vmem>>, %arg4: memref<12x1xf32, #tpu.memory_space<vmem>>, %arg5: memref<12x8xf32, #tpu.memory_space<vmem>>) attributes {dimension_semantics = [#tpu.dimension_semantics<parallel>], iteration_bounds = array<i64: 1>, scalar_prefetch = 0 : i64, scratch_operands = 0 : i64, tpu.core_type = #tpu.core_type<tc>, window_params = [{transform_indices = @transform_0, window_bounds = array<i64: 2, 8>}, {pipeline_mode = #tpu.pipeline_mode<synchronous>, transform_indices = @transform_1, window_bounds = array<i64: 32, 3>}, {pipeline_mode = #tpu.pipeline_mode<synchronous>, transform_indices = @transform_2, window_bounds = array<i64: 12, 32>}, {pipeline_mode = #tpu.pipeline_mode<synchronous>, transform_indices = @transform_3, window_bounds = array<i64: 12, 1>}, {transform_indices = @transform_4, window_bounds = array<i64: 12, 8>}]} {
    %c0 = arith.constant 0 : index
    %c0_0 = arith.constant 0 : index
    %0 = vector.load %arg1[%c0, %c0_0] : memref<2x8xf32, #tpu.memory_space<vmem>>, vector<2x8xf32>
    %c0_1 = arith.constant 0 : index
    %c0_2 = arith.constant 0 : index
    %1 = vector.load %arg2[%c0_1, %c0_2] : memref<32x3xf32, #tpu.memory_space<vmem>>, vector<32x3xf32>
    %2 = vector.extract_strided_slice %1 {offsets = [0, 0], sizes = [32, 1], strides = [1, 1]} : vector<32x3xf32> to vector<32x1xf32>
    %3 = vector.extract_strided_slice %0 {offsets = [0, 0], sizes = [1, 8], strides = [1, 1]} : vector<2x8xf32> to vector<1x8xf32>
    %4 = vector.broadcast %2 : vector<32x1xf32> to vector<32x8xf32>
    %5 = vector.broadcast %3 : vector<1x8xf32> to vector<32x8xf32>
    %6 = arith.mulf %4, %5 : vector<32x8xf32>
    %7 = vector.extract_strided_slice %1 {offsets = [0, 1], sizes = [32, 1], strides = [1, 1]} : vector<32x3xf32> to vector<32x1xf32>
    %8 = vector.extract_strided_slice %0 {offsets = [1, 0], sizes = [1, 8], strides = [1, 1]} : vector<2x8xf32> to vector<1x8xf32>
    %9 = vector.broadcast %7 : vector<32x1xf32> to vector<32x8xf32>
    %10 = vector.broadcast %8 : vector<1x8xf32> to vector<32x8xf32>
    %11 = arith.mulf %9, %10 : vector<32x8xf32>
    %12 = arith.addf %6, %11 : vector<32x8xf32>
    %13 = vector.extract_strided_slice %1 {offsets = [0, 2], sizes = [32, 1], strides = [1, 1]} : vector<32x3xf32> to vector<32x1xf32>
    %14 = vector.broadcast %13 : vector<32x1xf32> to vector<32x8xf32>
    %15 = arith.addf %12, %14 : vector<32x8xf32>
    %16 = math.tanh %15 : vector<32x8xf32>
    %c0_3 = arith.constant 0 : index
    %c0_4 = arith.constant 0 : index
    %17 = vector.load %arg3[%c0_3, %c0_4] : memref<12x32xf32, #tpu.memory_space<vmem>>, vector<12x32xf32>
    %cst = arith.constant dense<0.000000e+00> : vector<12x8xf32>
    %18 = tpu.matmul %17, %16, %cst {dimension_numbers = #tpu.dot_dimension_numbers<[1], [0], [0], [1], [0, 0, 1, 1], [], []>} : vector<12x32xf32>, vector<32x8xf32>, vector<12x8xf32> -> vector<12x8xf32>
    %c0_5 = arith.constant 0 : index
    %c0_6 = arith.constant 0 : index
    %19 = vector.load %arg4[%c0_5, %c0_6] : memref<12x1xf32, #tpu.memory_space<vmem>>, vector<12x1xf32>
    %20 = vector.broadcast %19 : vector<12x1xf32> to vector<12x8xf32>
    %21 = arith.addf %18, %20 : vector<12x8xf32>
    %22 = vector.extract_strided_slice %21 {offsets = [8, 0], sizes = [4, 8], strides = [1, 1]} : vector<12x8xf32> to vector<4x8xf32>
    %cst_7 = arith.constant dense<0xFF800000> : vector<8xf32>
    %23 = vector.multi_reduction <maximumf>, %22, %cst_7 [0] : vector<4x8xf32> to vector<8xf32>
    %24 = vector.shape_cast %23 : vector<8xf32> to vector<1x8xf32>
    %25 = vector.broadcast %24 : vector<1x8xf32> to vector<4x8xf32>
    %26 = arith.subf %22, %25 : vector<4x8xf32>
    %27 = math.exp %26 : vector<4x8xf32>
    %cst_8 = arith.constant dense<0.000000e+00> : vector<8xf32>
    %28 = vector.multi_reduction <add>, %27, %cst_8 [0] : vector<4x8xf32> to vector<8xf32>
    %29 = vector.shape_cast %28 : vector<8xf32> to vector<1x8xf32>
    %30 = tpu.reciprocal %29 : vector<1x8xf32> -> vector<1x8xf32>
    %31 = vector.broadcast %30 : vector<1x8xf32> to vector<4x8xf32>
    %32 = arith.mulf %27, %31 : vector<4x8xf32>
    %33 = vector.extract_strided_slice %21 {offsets = [0, 0], sizes = [8, 8], strides = [1, 1]} : vector<12x8xf32> to vector<8x8xf32>
    %c0_9 = arith.constant 0 : index
    %c0_10 = arith.constant 0 : index
    %34 = vector.load %arg5[%c0_9, %c0_10] : memref<12x8xf32, #tpu.memory_space<vmem>>, vector<8x8xf32>
    tpu.vector_store %arg5[%c0_9, %c0_10], %33 {strides = array<i32>} : memref<12x8xf32, #tpu.memory_space<vmem>>, vector<8x8xf32>,
    %c8 = arith.constant 8 : index
    %c0_11 = arith.constant 0 : index
    %35 = vector.load %arg5[%c8, %c0_11] : memref<12x8xf32, #tpu.memory_space<vmem>>, vector<4x8xf32>
    tpu.vector_store %arg5[%c8, %c0_11], %32 {strides = array<i32>} : memref<12x8xf32, #tpu.memory_space<vmem>>, vector<4x8xf32>,
    return
  }
  func.func @transform_0(%arg0: i32) -> (i32, i32) {
    %c0_i32 = arith.constant 0 : i32
    %c0_i32_0 = arith.constant 0 : i32
    return %c0_i32, %arg0 : i32, i32
  }
  func.func @transform_1(%arg0: i32) -> (i32, i32) {
    %c0_i32 = arith.constant 0 : i32
    %c0_i32_0 = arith.constant 0 : i32
    %c0_i32_1 = arith.constant 0 : i32
    return %c0_i32, %c0_i32_0 : i32, i32
  }
  func.func @transform_2(%arg0: i32) -> (i32, i32) {
    %c0_i32 = arith.constant 0 : i32
    %c0_i32_0 = arith.constant 0 : i32
    %c0_i32_1 = arith.constant 0 : i32
    return %c0_i32, %c0_i32_0 : i32, i32
  }
  func.func @transform_3(%arg0: i32) -> (i32, i32) {
    %c0_i32 = arith.constant 0 : i32
    %c0_i32_0 = arith.constant 0 : i32
    %c0_i32_1 = arith.constant 0 : i32
    return %c0_i32, %c0_i32_0 : i32, i32
  }
  func.func @transform_4(%arg0: i32) -> (i32, i32) {
    %c0_i32 = arith.constant 0 : i32
    %c0_i32_0 = arith.constant 0 : i32
    return %c0_i32, %arg0 : i32, i32
  }
}

</mosaic_0001>

<bundles_post_ra>
// kernel: tpu_custom_call.1
= control target key start
LH: loop header
LB: loop body
LE: loop exit
PB: predicated region body
PF: predicated region fallthrough
CT: control target
= control target key end

     0   :  { %v276_v0 = vmov 1   ;;  %v277_v1 = vmov 0   ;;  %v278_v6 = vmov 2   ;;  %vm116_vm0 = vcmask 261120   ;;  %s342_s1 = inlined_call_operand.vmem [shape: f32[32,3], index: 1, kind: input, shape index: {}]   ;;  %s343_s2 = inlined_call_operand.vmem [shape: f32[12,32], index: 2, kind: input, shape index: {}]   ;;  %s344_s3 = inlined_call_operand.vmem [shape: f32[12,1], index: 3, kind: input, shape index: {}]   ;;  %s345_s0 = inlined_call_operand.vmem [shape: f32[2,8], index: 0, kind: input, shape index: {}]   ;;  %s346_s4 = inlined_call_operand.vmem [shape: f32[12,8], index: 4, kind: output, shape index: {}]  }
   0x1   :  { %256 = vset.pattern.permute.xlu1 %v276_v0  ;;  %255 = vset.pattern.permute.xlu0 %v277_v1  ;;  %v18_v2 = vld [vmem:[%s342_s1] sm:$0xff]  ;;  %v19_v3 = vld [vmem:[%s342_s1 + $0x8] sm:$0xff]  ;;  %v20_v4 = vld [vmem:[%s342_s1 + $0x10] sm:$0xff]  ;;  %v42_v10 = vlaneseq  ;;  %vm198_vm1 = vcmask 60416   ;;  %vm218_vm2 = vcmask 64512  }
   0x2   :  { %51 = vperm.xlu1 %256, %v18_v2   ;;  %24 = vperm.xlu0 %255, %v18_v2   ;;  %v21_v5 = vld [vmem:[%s342_s1 + $0x18] sm:$0xff]  ;;  %v102_v7 = vld [vmem:[%s343_s2] sm:$0xff]  ;;  %v105_v8 = vld [vmem:[%s344_s3 + $0x8] sm:$0xf] }
   0x3   :  { %241 = vmatprep.mubr.msk.f32.mxu0 %vm116_vm0, %v102_v7  ;;  %v104_v9 = vld [vmem:[%s344_s3] sm:$0xff]  ;;  %v43_v13 = vshrl.u32 %v42_v10, 7  ;;  %v103_v51 = vld [vmem:[%s343_s2 + $0x8] sm:$0xf] }
   0x4   :  { %v17_v18 = vld [vmem:[%s345_s0] sm:$0x3] }
   0x5   :  { %v68_v16 = vsub.s32 1, %v43_v13  ;;  %v44_v17 = vsub.s32 0, %v43_v13 }
   0x6   :  { %55 = vperm.xlu1 %256, %v19_v3   ;;  %29 = vperm.xlu0 %255, %v19_v3  }
   0x7   :  { %v69_v21 = vrot.slane %v17_v18, %v68_v16  ;;  %v45_v22 = vrot.slane %v17_v18, %v44_v17 }
   0xa   :  { %257 = vset.pattern.permute.xlu1 %v277_v1  ;;  %34 = vperm.xlu0 %255, %v20_v4  }
   0xb   :  { %39 = vperm.xlu1 %257, %v21_v5  }
   0xe   :  { %258 = vset.pattern.permute.xlu0 %v276_v0 }
   0xf   :  { %259 = vset.pattern.permute.xlu1 %v276_v0  ;;  %59 = vperm.xlu0 %258, %v20_v4  }
  0x10   :  { %63 = vperm.xlu1 %259, %v21_v5  }
  0x13   :  { %261 = vset.pattern.permute.xlu0 %v278_v6 }
  0x14   :  { %260 = vset.pattern.permute.xlu1 %v278_v6  ;;  %83 = vperm.xlu0 %261, %v19_v3  }
  0x15   :  { %79 = vperm.xlu1 %260, %v18_v2  }
  0x18   :  { %262 = vset.pattern.permute.xlu0 %v277_v1 }
  0x19   :  { %87 = vperm.xlu1 %260, %v20_v4   ;;  %113 = vperm.xlu0 %262, %v105_v8  }
  0x1d   :  { %91 = vperm.xlu1 %260, %v21_v5  }
  0x21   :  { %263 = vset.pattern.permute.xlu1 %v277_v1 }
  0x22   :  { %108 = vperm.xlu1 %263, %v104_v9  }
  0x81   :  { %v52_v11 = vpop.permute.xlu1 %51  ;;  %v25_v12 = vpop.permute.xlu0 %24 }
  0x82   :  { %v70_v26 = vmul.f32 %v69_v21, %v52_v11  ;;  %v46_v27 = vmul.f32 %v45_v22, %v25_v12 }
  0x84   :  { %v74_v31 = vadd.f32 %v70_v26, %v46_v27 }
  0x85   :  { %v56_v14 = vpop.permute.xlu1 %55  ;;  %v30_v15 = vpop.permute.xlu0 %29 }
  0x86   :  { %v71_v23 = vmul.f32 %v69_v21, %v56_v14  ;;  %v47_v24 = vmul.f32 %v45_v22, %v30_v15 }
  0x88   :  { %v75_v29 = vadd.f32 %v71_v23, %v47_v24 }
  0x89   :  { %v35_v19 = vpop.permute.xlu0 %34 }
  0x8a   :  { %v40_v20 = vpop.permute.xlu1 %39  ;;  %v48_v36 = vmul.f32 %v45_v22, %v35_v19 }
  0x8b   :  { %v49_v40 = vmul.f32 %v45_v22, %v40_v20 }
  0x8e   :  { %v60_v25 = vpop.permute.xlu0 %59 }
  0x8f   :  { %v64_v28 = vpop.permute.xlu1 %63  ;;  %v72_v32 = vmul.f32 %v69_v21, %v60_v25 }
  0x90   :  { %v73_v37 = vmul.f32 %v69_v21, %v64_v28 }
  0x91   :  { %v76_v39 = vadd.f32 %v72_v32, %v48_v36 }
  0x92   :  { %v77_v42 = vadd.f32 %v73_v37, %v49_v40 }
  0x93   :  { %v84_v30 = vpop.permute.xlu0 %83 }
  0x94   :  { %v95_v33 = vadd.f32 %v84_v30, %v75_v29  ;;  %v80_v34 = vpop.permute.xlu1 %79 }
  0x95   :  { %v94_v35 = vadd.f32 %v80_v34, %v74_v31 }
  0x96   :  { %264 = vtanh.f32 %v95_v33 }
  0x97   :  { %266 = vtanh.f32 %v94_v35 }
  0x98   :  { %v88_v38 = vpop.permute.xlu1 %87  ;;  %v114_v52 = vpop.permute.xlu0 %113 }
  0x99   :  { %v96_v41 = vadd.f32 %v88_v38, %v76_v39 }
  0x9b   :  { %268 = vtanh.f32 %v96_v41 }
  0x9c   :  { %v92_v43 = vpop.permute.xlu1 %91 }
  0x9d   :  { %v97_v44 = vadd.f32 %v92_v43, %v77_v42 }
  0x9f   :  { %270 = vtanh.f32 %v97_v44 }
  0xa0   :  { %v265_v45 = vpop.eup %264 }
  0xa1   :  { %v267_v46 = vpop.eup %266  ;;  %v109_v53 = vpop.permute.xlu1 %108 }
  0xa2   :  { %v244_v47 = vpack.c.bf16 %v265_v45, %v267_v46 }
  0xa4   :  { %245 = vmatprep.subr.bf16.mxu0 %v244_v47 }
  0xa5   :  { %247 = vmatpush3.bf16.msra.mxu0 %v244_v47  ;;  %v269_v48 = vpop.eup %268 }
  0xa9   :  { %v271_v49 = vpop.eup %270 }
  0xaa   :  { %v248_v50 = vpack.c.bf16 %v271_v49, %v269_v48 }
  0xac   :  { %249 = vmatprep.subr.bf16.mxu0 %v248_v50 }
  0xad   :  { %251 = vmatpush3.bf16.msra.mxu0 %v248_v50 }
  0xb0   :  { %242 = vmatmul.mubr.msk.f32.vlgmr.msra.gmra.mrb[0].mxu0 %vm116_vm0, %v103_v51 }
 0x183   :  { %v243_v54 = vpop.f32.mrb[0].mxu0 }
 0x184   :  { %v195_v55 = vadd.f32 %v243_v54, %v114_v52  ;;  %v189_v56 = vpop.f32.mrb[1].mxu0 }
 0x185   :  { %v190_v57 = vadd.f32 %v189_v56, %v109_v53 }
 0x186   :  { %v199_v58 = vsel %vm198_vm1, %v195_v55, -inf }
 0x187   :  { %v200_v59 = vrot.slane %v199_v58, 4  ;;  %219 = vst.msk [vmem:[%s346_s4] sm:$0xff] %vm218_vm2, %v190_v57 }
 0x189   :  { %v201_v60 = vmax.f32 %v199_v58, %v200_v59 }
 0x18b   :  { %v202_v61 = vrot.slane %v201_v60, 2 }
 0x18d   :  { %v203_v62 = vmax.f32 %v201_v60, %v202_v61 }
 0x18f   :  { %v204_v63 = vrot.slane %v203_v62, 1 }
 0x191   :  { %v205_v0 = vmax.f32 %v203_v62, %v204_v63 }
 0x193   :  { %v206_v1 = vsub.f32 %v195_v55, %v205_v0 }
 0x195   :  { %v207_v2 = vmul.f32 1.442695, %v206_v1 }
 0x197   :  { %272 = vpow2.f32 %v207_v2 }
 0x1a1   :  { %v273_v3 = vpop.eup %272 }
 0x1a2   :  { %v209_v4 = vsel %vm198_vm1, %v273_v3, 0.0 }
 0x1a3   :  { %v210_v5 = vrot.slane %v209_v4, 4 }
 0x1a5   :  { %v211_v6 = vadd.f32 %v210_v5, %v209_v4 }
 0x1a7   :  { %v212_v7 = vrot.slane %v211_v6, 2 }
 0x1a9   :  { %v213_v8 = vadd.f32 %v212_v7, %v211_v6 }
 0x1ab   :  { %v214_v9 = vrot.slane %v213_v8, 1 }
 0x1ad   :  { %v215_v10 = vadd.f32 %v214_v9, %v213_v8 }
 0x1af   :  { %274 = vrcp.f32 %v215_v10 }
 0x1b9   :  { %v275_v11 = vpop.eup %274 }
 0x1ba   :  { %v217_v12 = vmul.f32 %v275_v11, %v273_v3 }
 0x1bc   :  { %220 = vst.msk [vmem:[%s346_s4 + $0x8] sm:$0xf] %vm198_vm1, %v217_v12 }

</bundles_post_ra>
